<compile_context>
chip_gen: v7x
topology: tpu7x:2x2x1
jax: 0.10.0
libtpu: 0.0.40
codegen_flags: <defaults>
</compile_context>

<pallas_src>
import functools

import jax
import jax.numpy as jnp
from jax.experimental import pallas as pl
from jax.experimental.pallas import tpu as pltpu


def _round_up(x, m):
    return ((x + m - 1) // m) * m


def _vmem_spec():
    return pl.BlockSpec(memory_space=pltpu.MemorySpace.VMEM)


# ----------------------------------------------------------------------------
# Kernel 1: tiled dense layer  y = act(x @ W + b)   (bf16 MXU inputs, f32 accum)
# ----------------------------------------------------------------------------
def _linear_kernel(x_ref, w_ref, b_ref, o_ref, acc_ref, *, activation):
    k = pl.program_id(2)

    @pl.when(k == 0)
    def _():
        acc_ref[...] = jnp.zeros_like(acc_ref)

    acc_ref[...] += jnp.dot(x_ref[...], w_ref[...],
                            preferred_element_type=jnp.float32)

    @pl.when(k == pl.num_programs(2) - 1)
    def _():
        y = acc_ref[...] + b_ref[...]                      # [tm,tn] + [1,tn]
        if activation == "tanh":
            y = jnp.tanh(y)                                # f32 epilogue (v5e-safe)
        elif activation == "relu":
            y = jnp.maximum(y, 0.0)
        o_ref[...] = y.astype(o_ref.dtype)


def linear(x, w, b, activation="none", out_dtype=jnp.bfloat16,
           tm=256, tn=256, tk=512):
    M, K = x.shape
    N = w.shape[1]
    Mp = _round_up(M, 8)
    Kp = _round_up(K, 128)
    Np = _round_up(N, 128)
    tm = min(tm, Mp)
    tk = min(tk, Kp)
    tn = min(tn, Np)
    Mp = _round_up(Mp, tm)
    Kp = _round_up(Kp, tk)
    Np = _round_up(Np, tn)

    xp = jnp.zeros((Mp, Kp), jnp.bfloat16).at[:M, :K].set(x.astype(jnp.bfloat16))
    wp = jnp.zeros((Kp, Np), jnp.bfloat16).at[:K, :N].set(w.astype(jnp.bfloat16))
    bp = jnp.zeros((1, Np), jnp.float32).at[:, :N].set(b.astype(jnp.float32)[None, :])

    out = pl.pallas_call(
        functools.partial(_linear_kernel, activation=activation),
        out_shape=jax.ShapeDtypeStruct((Mp, Np), out_dtype),
        grid_spec=pltpu.PrefetchScalarGridSpec(
            num_scalar_prefetch=0,
            grid=(Mp // tm, Np // tn, Kp // tk),
            in_specs=[
                pl.BlockSpec((tm, tk), lambda i, j, k: (i, k)),
                pl.BlockSpec((tk, tn), lambda i, j, k: (k, j)),
                pl.BlockSpec((1, tn), lambda i, j, k: (0, j)),
            ],
            out_specs=pl.BlockSpec((tm, tn), lambda i, j, k: (i, j)),
            scratch_shapes=[pltpu.VMEM((tm, tn), jnp.float32)],
        ),
        compiler_params=pltpu.CompilerParams(
            dimension_semantics=("parallel", "parallel", "arbitrary")),
    )(xp, wp, bp)
    return out[:M, :N]


# ----------------------------------------------------------------------------
# Kernel 2: fused masked means (subject entity, object entity, GCN window mean)
#   one HBM read of the [B, L, H] hidden tensor; reduction runs on the MXU.
# ----------------------------------------------------------------------------
def _pooling_kernel(h_ref, m_ref, o_ref):
    h = h_ref[...]                                          # [bt, L, H] bf16
    m = m_ref[...]                                          # [bt, 3, L] f32 (0/1)
    summed = jnp.einsum("bml,blh->bmh", m.astype(jnp.bfloat16), h,
                        preferred_element_type=jnp.float32)  # MXU contraction
    count = jnp.sum(m, axis=2)                              # [bt, 3]
    inv = pl.reciprocal(jnp.maximum(count, 1.0), approx=True)
    o_ref[...] = (summed * inv[:, :, None]).astype(o_ref.dtype)


def fused_masked_means(hidden, masks, bt=8):
    B, L, H = hidden.shape
    Bp = _round_up(B, bt)
    hp = jnp.zeros((Bp, L, H), hidden.dtype).at[:B].set(hidden)
    mp = jnp.zeros((Bp, 3, L), jnp.float32).at[:B].set(masks)
    out = pl.pallas_call(
        _pooling_kernel,
        out_shape=jax.ShapeDtypeStruct((Bp, 3, H), jnp.float32),
        grid_spec=pltpu.PrefetchScalarGridSpec(
            num_scalar_prefetch=0,
            grid=(Bp // bt,),
            in_specs=[
                pl.BlockSpec((bt, L, H), lambda b: (b, 0, 0)),
                pl.BlockSpec((bt, 3, L), lambda b: (b, 0, 0)),
            ],
            out_specs=pl.BlockSpec((bt, 3, H), lambda b: (b, 0, 0)),
        ),
        compiler_params=pltpu.CompilerParams(dimension_semantics=("parallel",)),
    )(hp, mp)
    return out[:B]                                          # [B, 3, H] f32


# ----------------------------------------------------------------------------
# Kernel 3: fused GCN head + classifier
#   g      = relu(mean_x @ gcn_w + gcn_b)           (== every GCN node feature)
#   logits = ss@W_ss + os@W_os + pooled@W_pool + g@(W_sg+W_og+W_hout) + b
#   Output is lane-dense ([B, 128]-padded) and sliced in the wrapper.
# ----------------------------------------------------------------------------
def _head_kernel(ss_ref, os_ref, mx_ref, pooled_ref,
                 gcn_w_ref, gcn_b_ref,
                 w_ss_ref, w_os_ref, w_pool_ref, w_g_ref, cls_b_ref, o_ref):
    mean_x = mx_ref[...].astype(jnp.bfloat16)               # [B, H]
    g = jnp.maximum(
        jnp.dot(mean_x, gcn_w_ref[...], preferred_element_type=jnp.float32)
        + gcn_b_ref[...], 0.0)                              # [B, G]
    logits = (
        jnp.dot(ss_ref[...].astype(jnp.bfloat16), w_ss_ref[...],
                preferred_element_type=jnp.float32)
        + jnp.dot(os_ref[...].astype(jnp.bfloat16), w_os_ref[...],
                  preferred_element_type=jnp.float32)
        + jnp.dot(pooled_ref[...].astype(jnp.bfloat16), w_pool_ref[...],
                  preferred_element_type=jnp.float32)
        + jnp.dot(g.astype(jnp.bfloat16), w_g_ref[...],
                  preferred_element_type=jnp.float32)
        + cls_b_ref[...])
    o_ref[...] = logits.astype(o_ref.dtype)


def fused_head(ss_e, os_e, mean_x, pooled, gcn_w, gcn_b,
               w_ss, w_os, w_pool, w_g, cls_b, num_class):
    B = ss_e.shape[0]
    Cp = _round_up(num_class, 128)

    def pad_cols(w):
        return (jnp.zeros((w.shape[0], Cp), jnp.bfloat16)
                .at[:, :num_class].set(w.astype(jnp.bfloat16)))

    logits = pl.pallas_call(
        _head_kernel,
        out_shape=jax.ShapeDtypeStruct((B, Cp), jnp.float32),
        in_specs=[_vmem_spec()] * 11,
        out_specs=_vmem_spec(),
    )(ss_e, os_e, mean_x, pooled.astype(jnp.bfloat16),
      gcn_w.astype(jnp.bfloat16), gcn_b.astype(jnp.float32)[None, :],
      pad_cols(w_ss), pad_cols(w_os), pad_cols(w_pool), pad_cols(w_g),
      jnp.zeros((1, Cp), jnp.float32).at[:, :num_class].set(
          cls_b.astype(jnp.float32)[None, :]))
    return logits[:, :num_class]


# ----------------------------------------------------------------------------
# Parameters (deterministic, synthetic)
# ----------------------------------------------------------------------------
def init_params(key, vocab, emb_dim, hidden, graph_hidden, num_class):
    ks = jax.random.split(key, 8)
    s = 0.02
    classifier_dim = hidden * 3 + graph_hidden * 3
    return {
        "embed":  s * jax.random.normal(ks[0], (vocab, emb_dim), jnp.float32),
        "enc_w":  s * jax.random.normal(ks[1], (emb_dim, hidden), jnp.float32),
        "enc_b":  jnp.zeros((hidden,), jnp.float32),
        "pool_w": s * jax.random.normal(ks[2], (hidden, hidden), jnp.float32),
        "pool_b": jnp.zeros((hidden,), jnp.float32),
        "gcn_w":  s * jax.random.normal(ks[3], (hidden, graph_hidden), jnp.float32),
        "gcn_b":  jnp.zeros((graph_hidden,), jnp.float32),
        "cls_w":  s * jax.random.normal(ks[4], (classifier_dim, num_class), jnp.float32),
        "cls_b":  jnp.zeros((num_class,), jnp.float32),
    }


# ----------------------------------------------------------------------------
# REModel.forward
# ----------------------------------------------------------------------------
def re_model_forward(params, input_ids, attention_mask, s_mask, o_mask, labels=None):
    B, L = input_ids.shape
    H = params["enc_w"].shape[1]
    G = params["gcn_w"].shape[1]
    num_class = params["cls_b"].shape[0]

    # real_length stays on device (no host sync / no per-length recompile); the truncated
    # all-ones-adjacency window is a batch-wide validity mask, matching the PyTorch model
    # (padding positions of shorter sequences inside the window still contribute).
    lengths = jnp.sum((attention_mask != 0).astype(jnp.int32), axis=1)
    real_length = jnp.max(lengths)
    valid = jnp.broadcast_to(
        (jnp.arange(L)[None, :] < real_length).astype(jnp.float32), (B, L))

    # --- synthetic encoder (stand-in for RobertaModel) ---
    emb = params["embed"][input_ids]                                 # [B, L, E] gather (glue)
    word_embedding = linear(emb.reshape(B * L, -1), params["enc_w"], params["enc_b"],
                            out_dtype=jnp.bfloat16).reshape(B, L, H)
    pooled_output = linear(word_embedding[:, 0, :], params["pool_w"], params["pool_b"],
                           activation="tanh", out_dtype=jnp.bfloat16)

    # --- fused masked means: subject entity, object entity, GCN window mean ---
    masks = jnp.stack([(s_mask != 0).astype(jnp.float32),
                       (o_mask != 0).astype(jnp.float32),
                       valid], axis=1)                               # [B, 3, L]
    ents = fused_masked_means(word_embedding, masks)                 # [B, 3, H] f32
    ss_emb, os_emb, mean_x = ents[:, 0], ents[:, 1], ents[:, 2]

    # --- fused GCN head + classifier ---
    # classifier_dim row order: [ss(H), subj_gcn(G), os(H), obj_gcn(G), pooled(H), h_out(G)]
    cw = params["cls_w"]
    w_ss = cw[0:H]
    w_sg = cw[H:H + G]
    w_os = cw[H + G:2 * H + G]
    w_og = cw[2 * H + G:2 * H + 2 * G]
    w_pool = cw[2 * H + 2 * G:3 * H + 2 * G]
    w_hout = cw[3 * H + 2 * G:]
    # all-ones adjacency => subj_gcn == obj_gcn == h_out == g, so their weight slices fold.
    w_g = w_sg + w_og + w_hout

    logits = fused_head(ss_emb, os_emb, mean_x, pooled_output,
                        params["gcn_w"], params["gcn_b"],
                        w_ss, w_os, w_pool, w_g, params["cls_b"], num_class)

    outputs = (logits,)
    if labels is not None:
        logp = jax.nn.log_softmax(logits.astype(jnp.float32), axis=-1)
        loss = -jnp.mean(jnp.take_along_axis(logp, labels[:, None], axis=1))
        outputs = (loss,) + outputs
    return outputs


if __name__ == "__main__":
    B, L = 2, 8
    VOCAB, EMB, HIDDEN, GRAPH_HIDDEN, NUM_CLASS = 64, 32, 32, 16, 5

    key = jax.random.PRNGKey(0)
    pkey, ikey = jax.random.split(key)
    params = init_params(pkey, VOCAB, EMB, HIDDEN, GRAPH_HIDDEN, NUM_CLASS)

    input_ids = jax.random.randint(ikey, (B, L), 0, VOCAB, dtype=jnp.int32)
    # attention lengths 7 and 5 -> real_length = 7 (exercises the window masking path)
    attention_mask = jnp.array([[1, 1, 1, 1, 1, 1, 1, 0],
                                [1, 1, 1, 1, 1, 0, 0, 0]], jnp.float32)
    s_mask = jnp.array([[0, 1, 1, 0, 0, 0, 0, 0],
                        [0, 1, 0, 0, 0, 0, 0, 0]], jnp.float32)
    o_mask = jnp.array([[0, 0, 0, 1, 1, 0, 0, 0],
                        [0, 0, 0, 1, 0, 0, 0, 0]], jnp.float32)
    labels = jnp.array([1, 3], jnp.int32)

    fwd = jax.jit(re_model_forward)
    loss, logits = fwd(params, input_ids, attention_mask, s_mask, o_mask, labels)
    jax.block_until_ready((loss, logits))
    assert logits.shape == (B, NUM_CLASS)
    assert bool(jnp.all(jnp.isfinite(logits))) and bool(jnp.isfinite(loss))
    print("KERNEL_OK")
</pallas_src>

<mosaic_0001>
module attributes {stable_mosaic.version = 11 : i64} {
  func.func @_linear_kernel(%arg0: i32, %arg1: i32, %arg2: i32, %arg3: memref<8x128xbf16, #tpu.memory_space<vmem>>, %arg4: memref<128x128xbf16, #tpu.memory_space<vmem>>, %arg5: memref<1x128xf32, #tpu.memory_space<vmem>>, %arg6: memref<8x128xbf16, #tpu.memory_space<vmem>>, %arg7: memref<8x128xf32, #tpu.memory_space<vmem>>) attributes {dimension_semantics = [#tpu.dimension_semantics<parallel>, #tpu.dimension_semantics<parallel>, #tpu.dimension_semantics<arbitrary>], iteration_bounds = array<i64: 1, 1, 1>, scalar_prefetch = 0 : i64, scratch_operands = 1 : i64, tpu.core_type = #tpu.core_type<tc>, window_params = [{transform_indices = @transform_0, window_bounds = array<i64: 8, 128>}, {transform_indices = @transform_1, window_bounds = array<i64: 128, 128>}, {transform_indices = @transform_2, window_bounds = array<i64: 1, 128>}, {transform_indices = @transform_3, window_bounds = array<i64: 8, 128>}]} {
    %c0_i32 = arith.constant 0 : i32
    %0 = arith.cmpi eq, %arg2, %c0_i32 : i32
    %1 = arith.extui %0 : i1 to i32
    %c0_i32_0 = arith.constant 0 : i32
    %2 = arith.cmpi ne, %1, %c0_i32_0 : i32
    scf.if %2 {
      %cst_10 = arith.constant 0.000000e+00 : f32
      %12 = vector.broadcast %cst_10 : f32 to vector<8x128xf32>
      %c0_11 = arith.constant 0 : index
      %c0_12 = arith.constant 0 : index
      %13 = vector.load %arg7[%c0_11, %c0_12] : memref<8x128xf32, #tpu.memory_space<vmem>>, vector<8x128xf32>
      tpu.vector_store %arg7[%c0_11, %c0_12], %12 {strides = array<i32>} : memref<8x128xf32, #tpu.memory_space<vmem>>, vector<8x128xf32>,
    } else {
    }
    %c0 = arith.constant 0 : index
    %c0_1 = arith.constant 0 : index
    %3 = vector.load %arg7[%c0, %c0_1] : memref<8x128xf32, #tpu.memory_space<vmem>>, vector<8x128xf32>
    %c0_2 = arith.constant 0 : index
    %c0_3 = arith.constant 0 : index
    %4 = vector.load %arg3[%c0_2, %c0_3] : memref<8x128xbf16, #tpu.memory_space<vmem>>, vector<8x128xbf16>
    %c0_4 = arith.constant 0 : index
    %c0_5 = arith.constant 0 : index
    %5 = vector.load %arg4[%c0_4, %c0_5] : memref<128x128xbf16, #tpu.memory_space<vmem>>, vector<128x128xbf16>
    %cst = arith.constant dense<0.000000e+00> : vector<8x128xf32>
    %6 = tpu.matmul %4, %5, %cst {dimension_numbers = #tpu.dot_dimension_numbers<[1], [0], [0], [1], [0, 0, 1, 1], [], []>} : vector<8x128xbf16>, vector<128x128xbf16>, vector<8x128xf32> -> vector<8x128xf32>
    %7 = arith.addf %3, %6 : vector<8x128xf32>
    %c0_6 = arith.constant 0 : index
    %c0_7 = arith.constant 0 : index
    %8 = vector.load %arg7[%c0_6, %c0_7] : memref<8x128xf32, #tpu.memory_space<vmem>>, vector<8x128xf32>
    tpu.vector_store %arg7[%c0_6, %c0_7], %7 {strides = array<i32>} : memref<8x128xf32, #tpu.memory_space<vmem>>, vector<8x128xf32>,
    %c0_i32_8 = arith.constant 0 : i32
    %9 = arith.cmpi eq, %arg2, %c0_i32_8 : i32
    %10 = arith.extui %9 : i1 to i32
    %c0_i32_9 = arith.constant 0 : i32
    %11 = arith.cmpi ne, %10, %c0_i32_9 : i32
    scf.if %11 {
      %c0_10 = arith.constant 0 : index
      %c0_11 = arith.constant 0 : index
      %12 = vector.load %arg7[%c0_10, %c0_11] : memref<8x128xf32, #tpu.memory_space<vmem>>, vector<8x128xf32>
      %c0_12 = arith.constant 0 : index
      %c0_13 = arith.constant 0 : index
      %13 = vector.load %arg5[%c0_12, %c0_13] : memref<1x128xf32, #tpu.memory_space<vmem>>, vector<1x128xf32>
      %14 = vector.broadcast %13 : vector<1x128xf32> to vector<8x128xf32>
      %15 = arith.addf %12, %14 : vector<8x128xf32>
      %16 = math.tanh %15 : vector<8x128xf32>
      %17 = arith.truncf %16 : vector<8x128xf32> to vector<8x128xbf16>
      %c0_14 = arith.constant 0 : index
      %c0_15 = arith.constant 0 : index
      %18 = vector.load %arg6[%c0_14, %c0_15] : memref<8x128xbf16, #tpu.memory_space<vmem>>, vector<8x128xbf16>
      tpu.vector_store %arg6[%c0_14, %c0_15], %17 {strides = array<i32>} : memref<8x128xbf16, #tpu.memory_space<vmem>>, vector<8x128xbf16>,
    } else {
    }
    return
  }
  func.func @transform_0(%arg0: i32, %arg1: i32, %arg2: i32) -> (i32, i32) {
    %c0_i32 = arith.constant 0 : i32
    return %arg0, %arg2 : i32, i32
  }
  func.func @transform_1(%arg0: i32, %arg1: i32, %arg2: i32) -> (i32, i32) {
    %c0_i32 = arith.constant 0 : i32
    return %arg2, %arg1 : i32, i32
  }
  func.func @transform_2(%arg0: i32, %arg1: i32, %arg2: i32) -> (i32, i32) {
    %c0_i32 = arith.constant 0 : i32
    %c0_i32_0 = arith.constant 0 : i32
    return %c0_i32, %arg1 : i32, i32
  }
  func.func @transform_3(%arg0: i32, %arg1: i32, %arg2: i32) -> (i32, i32) {
    %c0_i32 = arith.constant 0 : i32
    return %arg0, %arg1 : i32, i32
  }
}

module attributes {stable_mosaic.version = 11 : i64} {
  func.func @_linear_kernel(%arg0: i32, %arg1: i32, %arg2: i32, %arg3: memref<16x128xbf16, #tpu.memory_space<vmem>>, %arg4: memref<128x128xbf16, #tpu.memory_space<vmem>>, %arg5: memref<1x128xf32, #tpu.memory_space<vmem>>, %arg6: memref<16x128xbf16, #tpu.memory_space<vmem>>, %arg7: memref<16x128xf32, #tpu.memory_space<vmem>>) attributes {dimension_semantics = [#tpu.dimension_semantics<parallel>, #tpu.dimension_semantics<parallel>, #tpu.dimension_semantics<arbitrary>], iteration_bounds = array<i64: 1, 1, 1>, scalar_prefetch = 0 : i64, scratch_operands = 1 : i64, tpu.core_type = #tpu.core_type<tc>, window_params = [{transform_indices = @transform_0, window_bounds = array<i64: 16, 128>}, {transform_indices = @transform_1, window_bounds = array<i64: 128, 128>}, {transform_indices = @transform_2, window_bounds = array<i64: 1, 128>}, {transform_indices = @transform_3, window_bounds = array<i64: 16, 128>}]} {
    %c0_i32 = arith.constant 0 : i32
    %0 = arith.cmpi eq, %arg2, %c0_i32 : i32
    %1 = arith.extui %0 : i1 to i32
    %c0_i32_0 = arith.constant 0 : i32
    %2 = arith.cmpi ne, %1, %c0_i32_0 : i32
    scf.if %2 {
      %cst_10 = arith.constant 0.000000e+00 : f32
      %12 = vector.broadcast %cst_10 : f32 to vector<16x128xf32>
      %c0_11 = arith.constant 0 : index
      %c0_12 = arith.constant 0 : index
      %13 = vector.load %arg7[%c0_11, %c0_12] : memref<16x128xf32, #tpu.memory_space<vmem>>, vector<16x128xf32>
      tpu.vector_store %arg7[%c0_11, %c0_12], %12 {strides = array<i32>} : memref<16x128xf32, #tpu.memory_space<vmem>>, vector<16x128xf32>,
    } else {
    }
    %c0 = arith.constant 0 : index
    %c0_1 = arith.constant 0 : index
    %3 = vector.load %arg7[%c0, %c0_1] : memref<16x128xf32, #tpu.memory_space<vmem>>, vector<16x128xf32>
    %c0_2 = arith.constant 0 : index
    %c0_3 = arith.constant 0 : index
    %4 = vector.load %arg3[%c0_2, %c0_3] : memref<16x128xbf16, #tpu.memory_space<vmem>>, vector<16x128xbf16>
    %c0_4 = arith.constant 0 : index
    %c0_5 = arith.constant 0 : index
    %5 = vector.load %arg4[%c0_4, %c0_5] : memref<128x128xbf16, #tpu.memory_space<vmem>>, vector<128x128xbf16>
    %cst = arith.constant dense<0.000000e+00> : vector<16x128xf32>
    %6 = tpu.matmul %4, %5, %cst {dimension_numbers = #tpu.dot_dimension_numbers<[1], [0], [0], [1], [0, 0, 1, 1], [], []>} : vector<16x128xbf16>, vector<128x128xbf16>, vector<16x128xf32> -> vector<16x128xf32>
    %7 = arith.addf %3, %6 : vector<16x128xf32>
    %c0_6 = arith.constant 0 : index
    %c0_7 = arith.constant 0 : index
    %8 = vector.load %arg7[%c0_6, %c0_7] : memref<16x128xf32, #tpu.memory_space<vmem>>, vector<16x128xf32>
    tpu.vector_store %arg7[%c0_6, %c0_7], %7 {strides = array<i32>} : memref<16x128xf32, #tpu.memory_space<vmem>>, vector<16x128xf32>,
    %c0_i32_8 = arith.constant 0 : i32
    %9 = arith.cmpi eq, %arg2, %c0_i32_8 : i32
    %10 = arith.extui %9 : i1 to i32
    %c0_i32_9 = arith.constant 0 : i32
    %11 = arith.cmpi ne, %10, %c0_i32_9 : i32
    scf.if %11 {
      %c0_10 = arith.constant 0 : index
      %c0_11 = arith.constant 0 : index
      %12 = vector.load %arg7[%c0_10, %c0_11] : memref<16x128xf32, #tpu.memory_space<vmem>>, vector<16x128xf32>
      %c0_12 = arith.constant 0 : index
      %c0_13 = arith.constant 0 : index
      %13 = vector.load %arg5[%c0_12, %c0_13] : memref<1x128xf32, #tpu.memory_space<vmem>>, vector<1x128xf32>
      %14 = vector.broadcast %13 : vector<1x128xf32> to vector<16x128xf32>
      %15 = arith.addf %12, %14 : vector<16x128xf32>
      %16 = arith.truncf %15 : vector<16x128xf32> to vector<16x128xbf16>
      %c0_14 = arith.constant 0 : index
      %c0_15 = arith.constant 0 : index
      %17 = vector.load %arg6[%c0_14, %c0_15] : memref<16x128xbf16, #tpu.memory_space<vmem>>, vector<16x128xbf16>
      tpu.vector_store %arg6[%c0_14, %c0_15], %16 {strides = array<i32>} : memref<16x128xbf16, #tpu.memory_space<vmem>>, vector<16x128xbf16>,
    } else {
    }
    return
  }
  func.func @transform_0(%arg0: i32, %arg1: i32, %arg2: i32) -> (i32, i32) {
    %c0_i32 = arith.constant 0 : i32
    return %arg0, %arg2 : i32, i32
  }
  func.func @transform_1(%arg0: i32, %arg1: i32, %arg2: i32) -> (i32, i32) {
    %c0_i32 = arith.constant 0 : i32
    return %arg2, %arg1 : i32, i32
  }
  func.func @transform_2(%arg0: i32, %arg1: i32, %arg2: i32) -> (i32, i32) {
    %c0_i32 = arith.constant 0 : i32
    %c0_i32_0 = arith.constant 0 : i32
    return %c0_i32, %arg1 : i32, i32
  }
  func.func @transform_3(%arg0: i32, %arg1: i32, %arg2: i32) -> (i32, i32) {
    %c0_i32 = arith.constant 0 : i32
    return %arg0, %arg1 : i32, i32
  }
}

module attributes {stable_mosaic.version = 11 : i64} {
  func.func @_pooling_kernel(%arg0: i32, %arg1: memref<8x8x32xbf16, #tpu.memory_space<vmem>>, %arg2: memref<8x3x8xf32, #tpu.memory_space<vmem>>, %arg3: memref<8x3x32xf32, #tpu.memory_space<vmem>>) attributes {dimension_semantics = [#tpu.dimension_semantics<parallel>], iteration_bounds = array<i64: 1>, scalar_prefetch = 0 : i64, scratch_operands = 0 : i64, tpu.core_type = #tpu.core_type<tc>, window_params = [{transform_indices = @transform_0, window_bounds = array<i64: 8, 8, 32>}, {transform_indices = @transform_1, window_bounds = array<i64: 8, 3, 8>}, {transform_indices = @transform_2, window_bounds = array<i64: 8, 3, 32>}]} {
    %c0 = arith.constant 0 : index
    %c0_0 = arith.constant 0 : index
    %c0_1 = arith.constant 0 : index
    %0 = vector.load %arg1[%c0, %c0_0, %c0_1] : memref<8x8x32xbf16, #tpu.memory_space<vmem>>, vector<8x8x32xbf16>
    %c0_2 = arith.constant 0 : index
    %c0_3 = arith.constant 0 : index
    %c0_4 = arith.constant 0 : index
    %1 = vector.load %arg2[%c0_2, %c0_3, %c0_4] : memref<8x3x8xf32, #tpu.memory_space<vmem>>, vector<8x3x8xf32>
    %2 = arith.truncf %1 : vector<8x3x8xf32> to vector<8x3x8xbf16>
    "tpu.trace_start"() <{level = 10 : i32, message = "bml,blh->bmh"}> : () -> ()
    %cst = arith.constant dense<0.000000e+00> : vector<8x3x32xf32>
    %3 = tpu.matmul %2, %0, %cst {dimension_numbers = #tpu.dot_dimension_numbers<[2], [1], [1], [2], [0, 0, 0, 1, 1, 2], [0], [0]>} : vector<8x3x8xbf16>, vector<8x8x32xbf16>, vector<8x3x32xf32> -> vector<8x3x32xf32>
    "tpu.trace_stop"() : () -> ()
    %cst_5 = arith.constant dense<0.000000e+00> : vector<8x3xf32>
    %4 = vector.multi_reduction <add>, %1, %cst_5 [2] : vector<8x3x8xf32> to vector<8x3xf32>
    %cst_6 = arith.constant 1.000000e+00 : f32
    %5 = vector.broadcast %cst_6 : f32 to vector<8x3xf32>
    %6 = arith.maximumf %4, %5 : vector<8x3xf32>
    %7 = tpu.reciprocal %6 {approx = true} : vector<8x3xf32> -> vector<8x3xf32>
    %8 = vector.shape_cast %7 : vector<8x3xf32> to vector<8x3x1xf32>
    %9 = vector.broadcast %8 : vector<8x3x1xf32> to vector<8x3x32xf32>
    %10 = arith.mulf %3, %9 : vector<8x3x32xf32>
    %c0_7 = arith.constant 0 : index
    %c0_8 = arith.constant 0 : index
    %c0_9 = arith.constant 0 : index
    %11 = vector.load %arg3[%c0_7, %c0_8, %c0_9] : memref<8x3x32xf32, #tpu.memory_space<vmem>>, vector<8x3x32xf32>
    tpu.vector_store %arg3[%c0_7, %c0_8, %c0_9], %10 {strides = array<i32>} : memref<8x3x32xf32, #tpu.memory_space<vmem>>, vector<8x3x32xf32>,
    return
  }
  func.func @transform_0(%arg0: i32) -> (i32, i32, i32) {
    %c0_i32 = arith.constant 0 : i32
    %c0_i32_0 = arith.constant 0 : i32
    %c0_i32_1 = arith.constant 0 : i32
    return %arg0, %c0_i32, %c0_i32_0 : i32, i32, i32
  }
  func.func @transform_1(%arg0: i32) -> (i32, i32, i32) {
    %c0_i32 = arith.constant 0 : i32
    %c0_i32_0 = arith.constant 0 : i32
    %c0_i32_1 = arith.constant 0 : i32
    return %arg0, %c0_i32, %c0_i32_0 : i32, i32, i32
  }
  func.func @transform_2(%arg0: i32) -> (i32, i32, i32) {
    %c0_i32 = arith.constant 0 : i32
    %c0_i32_0 = arith.constant 0 : i32
    %c0_i32_1 = arith.constant 0 : i32
    return %arg0, %c0_i32, %c0_i32_0 : i32, i32, i32
  }
}

module attributes {stable_mosaic.version = 11 : i64} {
  func.func @_head_kernel(%arg0: memref<2x32xf32, #tpu.memory_space<vmem>>, %arg1: memref<2x32xf32, #tpu.memory_space<vmem>>, %arg2: memref<2x32xf32, #tpu.memory_space<vmem>>, %arg3: memref<2x32xbf16, #tpu.memory_space<vmem>>, %arg4: memref<32x16xbf16, #tpu.memory_space<vmem>>, %arg5: memref<1x16xf32, #tpu.memory_space<vmem>>, %arg6: memref<32x128xbf16, #tpu.memory_space<vmem>>, %arg7: memref<32x128xbf16, #tpu.memory_space<vmem>>, %arg8: memref<32x128xbf16, #tpu.memory_space<vmem>>, %arg9: memref<16x128xbf16, #tpu.memory_space<vmem>>, %arg10: memref<1x128xf32, #tpu.memory_space<vmem>>, %arg11: memref<2x128xf32, #tpu.memory_space<vmem>>) attributes {dimension_semantics = [], scalar_prefetch = 0 : i64, scratch_operands = 0 : i64, tpu.core_type = #tpu.core_type<tc>} {
    %c0 = arith.constant 0 : index
    %c0_0 = arith.constant 0 : index
    %0 = vector.load %arg2[%c0, %c0_0] : memref<2x32xf32, #tpu.memory_space<vmem>>, vector<2x32xf32>
    %1 = arith.truncf %0 : vector<2x32xf32> to vector<2x32xbf16>
    %c0_1 = arith.constant 0 : index
    %c0_2 = arith.constant 0 : index
    %2 = vector.load %arg4[%c0_1, %c0_2] : memref<32x16xbf16, #tpu.memory_space<vmem>>, vector<32x16xbf16>
    %cst = arith.constant dense<0.000000e+00> : vector<2x16xf32>
    %3 = tpu.matmul %1, %2, %cst {dimension_numbers = #tpu.dot_dimension_numbers<[1], [0], [0], [1], [0, 0, 1, 1], [], []>} : vector<2x32xbf16>, vector<32x16xbf16>, vector<2x16xf32> -> vector<2x16xf32>
    %c0_3 = arith.constant 0 : index
    %c0_4 = arith.constant 0 : index
    %4 = vector.load %arg5[%c0_3, %c0_4] : memref<1x16xf32, #tpu.memory_space<vmem>>, vector<1x16xf32>
    %5 = vector.broadcast %4 : vector<1x16xf32> to vector<2x16xf32>
    %6 = arith.addf %3, %5 : vector<2x16xf32>
    %cst_5 = arith.constant 0.000000e+00 : f32
    %7 = vector.broadcast %cst_5 : f32 to vector<2x16xf32>
    %8 = arith.maximumf %6, %7 : vector<2x16xf32>
    %c0_6 = arith.constant 0 : index
    %c0_7 = arith.constant 0 : index
    %9 = vector.load %arg0[%c0_6, %c0_7] : memref<2x32xf32, #tpu.memory_space<vmem>>, vector<2x32xf32>
    %10 = arith.truncf %9 : vector<2x32xf32> to vector<2x32xbf16>
    %c0_8 = arith.constant 0 : index
    %c0_9 = arith.constant 0 : index
    %11 = vector.load %arg6[%c0_8, %c0_9] : memref<32x128xbf16, #tpu.memory_space<vmem>>, vector<32x128xbf16>
    %cst_10 = arith.constant dense<0.000000e+00> : vector<2x128xf32>
    %12 = tpu.matmul %10, %11, %cst_10 {dimension_numbers = #tpu.dot_dimension_numbers<[1], [0], [0], [1], [0, 0, 1, 1], [], []>} : vector<2x32xbf16>, vector<32x128xbf16>, vector<2x128xf32> -> vector<2x128xf32>
    %c0_11 = arith.constant 0 : index
    %c0_12 = arith.constant 0 : index
    %13 = vector.load %arg1[%c0_11, %c0_12] : memref<2x32xf32, #tpu.memory_space<vmem>>, vector<2x32xf32>
    %14 = arith.truncf %13 : vector<2x32xf32> to vector<2x32xbf16>
    %c0_13 = arith.constant 0 : index
    %c0_14 = arith.constant 0 : index
    %15 = vector.load %arg7[%c0_13, %c0_14] : memref<32x128xbf16, #tpu.memory_space<vmem>>, vector<32x128xbf16>
    %cst_15 = arith.constant dense<0.000000e+00> : vector<2x128xf32>
    %16 = tpu.matmul %14, %15, %cst_15 {dimension_numbers = #tpu.dot_dimension_numbers<[1], [0], [0], [1], [0, 0, 1, 1], [], []>} : vector<2x32xbf16>, vector<32x128xbf16>, vector<2x128xf32> -> vector<2x128xf32>
    %17 = arith.addf %12, %16 : vector<2x128xf32>
    %c0_16 = arith.constant 0 : index
    %c0_17 = arith.constant 0 : index
    %18 = vector.load %arg3[%c0_16, %c0_17] : memref<2x32xbf16, #tpu.memory_space<vmem>>, vector<2x32xbf16>
    %c0_18 = arith.constant 0 : index
    %c0_19 = arith.constant 0 : index
    %19 = vector.load %arg8[%c0_18, %c0_19] : memref<32x128xbf16, #tpu.memory_space<vmem>>, vector<32x128xbf16>
    %cst_20 = arith.constant dense<0.000000e+00> : vector<2x128xf32>
    %20 = tpu.matmul %18, %19, %cst_20 {dimension_numbers = #tpu.dot_dimension_numbers<[1], [0], [0], [1], [0, 0, 1, 1], [], []>} : vector<2x32xbf16>, vector<32x128xbf16>, vector<2x128xf32> -> vector<2x128xf32>
    %21 = arith.addf %17, %20 : vector<2x128xf32>
    %22 = arith.truncf %8 : vector<2x16xf32> to vector<2x16xbf16>
    %c0_21 = arith.constant 0 : index
    %c0_22 = arith.constant 0 : index
    %23 = vector.load %arg9[%c0_21, %c0_22] : memref<16x128xbf16, #tpu.memory_space<vmem>>, vector<16x128xbf16>
    %cst_23 = arith.constant dense<0.000000e+00> : vector<2x128xf32>
    %24 = tpu.matmul %22, %23, %cst_23 {dimension_numbers = #tpu.dot_dimension_numbers<[1], [0], [0], [1], [0, 0, 1, 1], [], []>} : vector<2x16xbf16>, vector<16x128xbf16>, vector<2x128xf32> -> vector<2x128xf32>
    %25 = arith.addf %21, %24 : vector<2x128xf32>
    %c0_24 = arith.constant 0 : index
    %c0_25 = arith.constant 0 : index
    %26 = vector.load %arg10[%c0_24, %c0_25] : memref<1x128xf32, #tpu.memory_space<vmem>>, vector<1x128xf32>
    %27 = vector.broadcast %26 : vector<1x128xf32> to vector<2x128xf32>
    %28 = arith.addf %25, %27 : vector<2x128xf32>
    %c0_26 = arith.constant 0 : index
    %c0_27 = arith.constant 0 : index
    %29 = vector.load %arg11[%c0_26, %c0_27] : memref<2x128xf32, #tpu.memory_space<vmem>>, vector<2x128xf32>
    tpu.vector_store %arg11[%c0_26, %c0_27], %28 {strides = array<i32>} : memref<2x128xf32, #tpu.memory_space<vmem>>, vector<2x128xf32>,
    return
  }
}

</mosaic_0001>

<bundles_post_ra>
// kernel: re_model_forward.4
= control target key start
LH: loop header
LB: loop body
LE: loop exit
PB: predicated region body
PF: predicated region fallthrough
CT: control target
= control target key end

     0   :  { %v227_v0 = vmov 0.0   ;;  %vm228_vm0 = vmmov 0   ;;  %s282_s1 = inlined_call_operand.vmem [shape: bf16[128,128], index: 1, kind: input, shape index: {}]   ;;  %s283_s0 = inlined_call_operand.vmem [shape: bf16[16,128], index: 0, kind: input, shape index: {}]   ;;  %s284_s2 = inlined_call_operand.vmem [shape: f32[1,128], index: 2, kind: input, shape index: {}]   ;;  %s285_s3 = inlined_call_operand.vmem [shape: bf16[16,128], index: 3, kind: output, shape index: {}]  }
   0x1   :  { %196 = vmatprep.subr.bf16.mxu0 %v227_v0  ;;  %v218_v1 = vld [vmem:[%s282_s1] sm:$0xff]   ;;  %212 = vmatprep.mubr.msk.bf16.mxu0 %vm228_vm0, %v227_v0  ;;  %v219_v2 = vld [vmem:[%s282_s1 + $0x8] sm:$0xff]   ;;  %v220_v3 = vld [vmem:[%s282_s1 + $0x10] sm:$0xff]  }
   0x2   :  { %197 = vmatpush3.bf16.msra.mxu0 %v218_v1  ;;  %v221_v4 = vld [vmem:[%s282_s1 + $0x18] sm:$0xff]   ;;  %v222_v5 = vld [vmem:[%s282_s1 + $0x20] sm:$0xff]   ;;  %v223_v6 = vld [vmem:[%s282_s1 + $0x28] sm:$0xff]  }
   0x3   :  { %198 = vmatprep.subr.bf16.mxu0 %v227_v0  ;;  %v224_v7 = vld [vmem:[%s282_s1 + $0x30] sm:$0xff]   ;;  %v225_v8 = vld [vmem:[%s282_s1 + $0x38] sm:$0xff]   ;;  %v226_v9 = vld [vmem:[%s283_s0] sm:$0xff]  }
   0x4   :  { %v177_v11 = vld [vmem:[%s284_s2] ss:$0 sm:$0xff] }
   0x6   :  { %199 = vmatpush3.bf16.msra.mxu0 %v219_v2 }
   0x7   :  { %200 = vmatprep.subr.bf16.mxu0 %v227_v0 }
   0xa   :  { %201 = vmatpush3.bf16.msra.mxu0 %v220_v3 }
   0xb   :  { %202 = vmatprep.subr.bf16.mxu0 %v227_v0 }
   0xe   :  { %203 = vmatpush3.bf16.msra.mxu0 %v221_v4 }
   0xf   :  { %204 = vmatprep.subr.bf16.mxu0 %v227_v0 }
  0x12   :  { %205 = vmatpush3.bf16.msra.mxu0 %v222_v5 }
  0x13   :  { %206 = vmatprep.subr.bf16.mxu0 %v227_v0 }
  0x16   :  { %207 = vmatpush3.bf16.msra.mxu0 %v223_v6 }
  0x17   :  { %208 = vmatprep.subr.bf16.mxu0 %v227_v0 }
  0x1a   :  { %209 = vmatpush3.bf16.msra.mxu0 %v224_v7 }
  0x1b   :  { %210 = vmatprep.subr.bf16.mxu0 %v227_v0 }
  0x1e   :  { %211 = vmatpush3.bf16.msra.mxu0 %v225_v8 }
  0x21   :  { %213 = vmatmul.mubr.bf16.vlgmr.msra.gmra.mrb[0].mxu0 %v226_v9 }
  0xf4   :  { %v129_v10 = vpop.f32.mrb[0].mxu0 }
  0xf5   :  { %v214_v12 = vpop.f32.mrb[1].mxu0  ;;  %v152_v14 = vadd.f32 %v177_v11, %v129_v10 }
  0xf6   :  { %v132_v13 = vpop.f32.mrb[2].mxu0 }
  0xf7   :  { %v153_v15 = vadd.f32 %v177_v11, %v132_v13  ;;  %v215_v16 = vpop.f32.mrb[3].mxu0 }
  0xf9   :  { %v185_v17 = vpack.c.bf16 %v153_v15, %v152_v14 }
  0xfb   :  { %186 = vst [vmem:[%s285_s3] sm:$0xff] %v185_v17  }

// kernel: re_model_forward.5
= control target key start
LH: loop header
LB: loop body
LE: loop exit
PB: predicated region body
PF: predicated region fallthrough
CT: control target
= control target key end

     0   :  { %v197_v0 = vmov 0.0   ;;  %vm198_vm0 = vmmov 0   ;;  %s252_s1 = inlined_call_operand.vmem [shape: bf16[128,128], index: 1, kind: input, shape index: {}]   ;;  %s253_s0 = inlined_call_operand.vmem [shape: bf16[8,128], index: 0, kind: input, shape index: {}]   ;;  %s254_s2 = inlined_call_operand.vmem [shape: f32[1,128], index: 2, kind: input, shape index: {}]   ;;  %s255_s3 = inlined_call_operand.vmem [shape: bf16[8,128], index: 3, kind: output, shape index: {}]  }
   0x1   :  { %165 = vmatprep.subr.bf16.mxu0 %v197_v0  ;;  %v187_v1 = vld [vmem:[%s252_s1] sm:$0xff]   ;;  %181 = vmatprep.mubr.msk.bf16.mxu0 %vm198_vm0, %v197_v0  ;;  %v188_v2 = vld [vmem:[%s252_s1 + $0x8] sm:$0xff]   ;;  %v189_v3 = vld [vmem:[%s252_s1 + $0x10] sm:$0xff]  }
   0x2   :  { %166 = vmatpush3.bf16.msra.mxu0 %v187_v1  ;;  %v190_v4 = vld [vmem:[%s252_s1 + $0x18] sm:$0xff]   ;;  %v191_v5 = vld [vmem:[%s252_s1 + $0x20] sm:$0xff]   ;;  %v192_v6 = vld [vmem:[%s252_s1 + $0x28] sm:$0xff]  }
   0x3   :  { %167 = vmatprep.subr.bf16.mxu0 %v197_v0  ;;  %v193_v7 = vld [vmem:[%s252_s1 + $0x30] sm:$0xff]   ;;  %v194_v8 = vld [vmem:[%s252_s1 + $0x38] sm:$0xff]   ;;  %v21_v9 = vld [vmem:[%s253_s0] sm:$0xf] }
   0x4   :  { %v155_v10 = vld [vmem:[%s254_s2] ss:$0 sm:$0xff] }
   0x6   :  { %168 = vmatpush3.bf16.msra.mxu0 %v188_v2 }
   0x7   :  { %169 = vmatprep.subr.bf16.mxu0 %v197_v0 }
   0xa   :  { %170 = vmatpush3.bf16.msra.mxu0 %v189_v3 }
   0xb   :  { %171 = vmatprep.subr.bf16.mxu0 %v197_v0 }
   0xe   :  { %172 = vmatpush3.bf16.msra.mxu0 %v190_v4 }
   0xf   :  { %173 = vmatprep.subr.bf16.mxu0 %v197_v0 }
  0x12   :  { %174 = vmatpush3.bf16.msra.mxu0 %v191_v5 }
  0x13   :  { %175 = vmatprep.subr.bf16.mxu0 %v197_v0 }
  0x16   :  { %176 = vmatpush3.bf16.msra.mxu0 %v192_v6 }
  0x17   :  { %177 = vmatprep.subr.bf16.mxu0 %v197_v0 }
  0x1a   :  { %178 = vmatpush3.bf16.msra.mxu0 %v193_v7 }
  0x1b   :  { %179 = vmatprep.subr.bf16.mxu0 %v197_v0 }
  0x1e   :  { %180 = vmatpush3.bf16.msra.mxu0 %v194_v8 }
  0x21   :  { %182 = vmatmul.mubr.bf16.vlgmr.msra.gmra.mrb[0].mxu0 %v21_v9 }
  0xf4   :  { %v120_v11 = vpop.f32.mrb[0].mxu0 }
  0xf5   :  { %v139_v12 = vadd.f32 %v155_v10, %v120_v11  ;;  %v183_v13 = vpop.f32.mrb[1].mxu0 }
  0xf6   :  { %v123_v14 = vpop.f32.mrb[2].mxu0 }
  0xf7   :  { %195 = vtanh.f32 %v139_v12  ;;  %v184_v15 = vpop.f32.mrb[3].mxu0 }
 0x101   :  { %v196_v16 = vpop.eup %195 }
 0x102   :  { %v141_v17 = vpack.c.bf16 %v196_v16, %v196_v16 }
 0x104   :  { %142 = vst [vmem:[%s255_s3] sm:$0xf] %v141_v17 }

// kernel: re_model_forward.6
= control target key start
LH: loop header
LB: loop body
LE: loop exit
PB: predicated region body
PF: predicated region fallthrough
CT: control target
= control target key end

     0   :  { %vm40_vm0 = vcmask 1043456   ;;  %v558_v0 = vmov 0.0   ;;  %vm559_vm1 = vmmov 0   ;;  %vm36_vm2 = vcmask 64512   ;;  %s703_s0 = inlined_call_operand.vmem [shape: bf16[8,8,32], index: 0, kind: input, shape index: {}]   ;;  %s704_s1 = inlined_call_operand.vmem [shape: f32[8,3,8], index: 1, kind: input, shape index: {}]   ;;  %s705_s2 = inlined_call_operand.vmem [shape: f32[8,3,32], index: 2, kind: output, shape index: {}]  }
   0x1   :  { %492 = vmatprep.subr.bf16.mxu0 %v558_v0  ;;  %498 = vmatprep.subr.bf16.mxu1 %v558_v0  ;;  %v12_v1 = vld [vmem:[%s703_s0] sm:$0xf]  ;;  %v13_v2 = vld [vmem:[%s703_s0 + $0x4] sm:$0xf]  ;;  %v14_v8 = vld [vmem:[%s703_s0 + $0x8] sm:$0xf] }
   0x2   :  { %v20_v3 = vld [vmem:[%s704_s1] sm:$0x7]  ;;  %v42_v4 = vsel %vm40_vm0, %v12_v1, 0  ;;  %v88_v5 = vsel %vm40_vm0, %v13_v2, 0  ;;  %494 = vmatprep.mubr.msk.bf16.mxu0 %vm559_vm1, %v558_v0  ;;  %500 = vmatprep.mubr.msk.bf16.mxu1 %vm559_vm1, %v558_v0  ;;  %v21_v7 = vld [vmem:[%s704_s1 + $0x4] sm:$0x7] }
   0x3   :  { %v28_v6 = vpack.c.bf16 %v20_v3, %v20_v3  ;;  %493 = vmatpush3.bf16.msra.mxu0 %v42_v4  ;;  %499 = vmatpush3.bf16.msra.mxu1 %v88_v5  ;;  %v29_v9 = vpack.c.bf16 %v21_v7, %v21_v7  ;;  %v15_v10 = vld [vmem:[%s703_s0 + $0xc] sm:$0xf]  ;;  %vm406_vm3 = vcmask 59392   ;;  %v134_v11 = vsel %vm40_vm0, %v14_v8, 0  ;;  %v22_v14 = vld [vmem:[%s704_s1 + $0x8] sm:$0x7] }
   0x4   :  { %504 = vmatprep.subr.bf16.mxu0 %v558_v0  ;;  %510 = vmatprep.subr.bf16.mxu1 %v558_v0  ;;  %v180_v12 = vsel %vm40_vm0, %v15_v10, 0  ;;  %v407_v13 = vsel %vm406_vm3, %v20_v3, 0.0  ;;  %v23_v15 = vld [vmem:[%s704_s1 + $0xc] sm:$0x7]  ;;  %v410_v16 = vsel %vm406_vm3, %v21_v7, 0.0  ;;  %v413_v17 = vsel %vm406_vm3, %v22_v14, 0.0 }
   0x5   :  { %408 = vadd.xlane.f32.xlu0 %v407_v13  ;;  %v16_v18 = vld [vmem:[%s703_s0 + $0x10] sm:$0xf]  ;;  %v17_v19 = vld [vmem:[%s703_s0 + $0x14] sm:$0xf]  ;;  %v30_v20 = vpack.c.bf16 %v22_v14, %v22_v14  ;;  %v31_v21 = vpack.c.bf16 %v23_v15, %v23_v15  ;;  %414 = vadd.xlane.f32.xlu1 %v413_v17  ;;  %v416_v26 = vsel %vm406_vm3, %v23_v15, 0.0  ;;  %vm455_vm4 = vcmask 256000  }
   0x6   :  { %495 = vmatmul.mubr.msk.bf16.vlgmr.msra.gmra.mrb[0].mxu0 %vm36_vm2, %v28_v6  ;;  %501 = vmatmul.mubr.msk.bf16.vlgmr.msra.gmra.mrb[0].mxu1 %vm36_vm2, %v29_v9  ;;  %v226_v22 = vsel %vm40_vm0, %v16_v18, 0  ;;  %v272_v23 = vsel %vm40_vm0, %v17_v19, 0  ;;  %v24_v24 = vld [vmem:[%s704_s1 + $0x10] sm:$0x7]  ;;  %v25_v25 = vld [vmem:[%s704_s1 + $0x14] sm:$0x7] }
   0x7   :  { %505 = vmatpush3.bf16.msra.mxu0 %v134_v11  ;;  %511 = vmatpush3.bf16.msra.mxu1 %v180_v12  ;;  %v419_v27 = vsel %vm406_vm3, %v24_v24, 0.0  ;;  %v18_v28 = vld [vmem:[%s703_s0 + $0x18] sm:$0xf]  ;;  %v19_v29 = vld [vmem:[%s703_s0 + $0x1c] sm:$0xf]  ;;  %v32_v30 = vpack.c.bf16 %v24_v24, %v24_v24  ;;  %v33_v31 = vpack.c.bf16 %v25_v25, %v25_v25  ;;  %v422_v35 = vsel %vm406_vm3, %v25_v25, 0.0 }
   0x8   :  { %506 = vmatprep.mubr.msk.bf16.mxu0 %vm559_vm1, %v558_v0  ;;  %512 = vmatprep.mubr.msk.bf16.mxu1 %vm559_vm1, %v558_v0  ;;  %v318_v32 = vsel %vm40_vm0, %v18_v28, 0  ;;  %v364_v33 = vsel %vm40_vm0, %v19_v29, 0  ;;  %v26_v34 = vld [vmem:[%s704_s1 + $0x18] sm:$0x7]  ;;  %v27_v37 = vld [vmem:[%s704_s1 + $0x1c] sm:$0x7] }
   0x9   :  { %516 = vmatprep.subr.bf16.mxu0 %v558_v0  ;;  %522 = vmatprep.subr.bf16.mxu1 %v558_v0  ;;  %v425_v36 = vsel %vm406_vm3, %v26_v34, 0.0  ;;  %v34_v38 = vpack.c.bf16 %v26_v34, %v26_v34  ;;  %v35_v39 = vpack.c.bf16 %v27_v37, %v27_v37  ;;  %v428_v40 = vsel %vm406_vm3, %v27_v37, 0.0 }
   0xa   :  { %411 = vadd.xlane.f32.xlu0 %v410_v16  ;;  %417 = vadd.xlane.f32.xlu1 %v416_v26 }
   0xe   :  { %507 = vmatmul.mubr.msk.bf16.vlgmr.msra.gmra.mrb[4].mxu0 %vm36_vm2, %v30_v20  ;;  %513 = vmatmul.mubr.msk.bf16.vlgmr.msra.gmra.mrb[4].mxu1 %vm36_vm2, %v31_v21 }
   0xf   :  { %517 = vmatpush3.bf16.msra.mxu0 %v226_v22  ;;  %523 = vmatpush3.bf16.msra.mxu1 %v272_v23 }
  0x10   :  { %518 = vmatprep.mubr.msk.bf16.mxu0 %vm559_vm1, %v558_v0  ;;  %524 = vmatprep.mubr.msk.bf16.mxu1 %vm559_vm1, %v558_v0 }
  0x11   :  { %528 = vmatprep.subr.bf16.mxu0 %v558_v0  ;;  %534 = vmatprep.subr.bf16.mxu1 %v558_v0 }
  0x12   :  { %420 = vadd.xlane.f32.xlu0 %v419_v27  ;;  %423 = vadd.xlane.f32.xlu1 %v422_v35 }
  0x16   :  { %519 = vmatmul.mubr.msk.bf16.vlgmr.msra.gmra.mrb[8].mxu0 %vm36_vm2, %v32_v30  ;;  %525 = vmatmul.mubr.msk.bf16.vlgmr.msra.gmra.mrb[8].mxu1 %vm36_vm2, %v33_v31 }
  0x17   :  { %529 = vmatpush3.bf16.msra.mxu0 %v318_v32  ;;  %535 = vmatpush3.bf16.msra.mxu1 %v364_v33 }
  0x18   :  { %530 = vmatprep.mubr.msk.bf16.mxu0 %vm559_vm1, %v558_v0  ;;  %536 = vmatprep.mubr.msk.bf16.mxu1 %vm559_vm1, %v558_v0 }
  0x19   :  { %426 = vadd.xlane.f32.xlu0 %v425_v36  ;;  %429 = vadd.xlane.f32.xlu1 %v428_v40 }
  0x1e   :  { %531 = vmatmul.mubr.msk.bf16.vlgmr.msra.gmra.mrb[12].mxu0 %vm36_vm2, %v34_v38  ;;  %537 = vmatmul.mubr.msk.bf16.vlgmr.msra.gmra.mrb[12].mxu1 %vm36_vm2, %v35_v39 }
  0x92   :  { %v409_v41 = vpop.xlane.xlu0 %408  ;;  %v415_v44 = vpop.xlane.xlu1 %414 }
  0x93   :  { %v431_v43 = vmax.f32 %v409_v41, 1.0  ;;  %v433_v47 = vmax.f32 %v415_v44, 1.0 }
  0x95   :  { %542 = vrcp.f32 %v431_v43 }
  0x97   :  { %v412_v42 = vpop.xlane.xlu0 %411  ;;  %v418_v46 = vpop.xlane.xlu1 %417 }
  0x98   :  { %v432_v45 = vmax.f32 %v412_v42, 1.0  ;;  %v434_v48 = vmax.f32 %v418_v46, 1.0 }
  0x9a   :  { %544 = vrcp.f32 %v432_v45 }
  0x9b   :  { %546 = vrcp.f32 %v433_v47 }
  0x9c   :  { %548 = vrcp.f32 %v434_v48 }
  0x9f   :  { %v421_v49 = vpop.xlane.xlu0 %420  ;;  %v543_v50 = vpop.eup %542 }
  0xa0   :  { %v424_v51 = vpop.xlane.xlu1 %423  ;;  %v435_v53 = vmax.f32 %v421_v49, 1.0 }
  0xa1   :  { %v436_v56 = vmax.f32 %v424_v51, 1.0 }
  0xa2   :  { %550 = vrcp.f32 %v435_v53 }
  0xa3   :  { %552 = vrcp.f32 %v436_v56 }
  0xa4   :  { %v545_v52 = vpop.eup %544 }
  0xa5   :  { %v547_v2 = vpop.eup %546 }
  0xa6   :  { %v427_v1 = vpop.xlane.xlu0 %426  ;;  %v430_v3 = vpop.xlane.xlu1 %429 }
  0xa7   :  { %v549_v4 = vpop.eup %548  ;;  %v437_v5 = vmax.f32 %v427_v1, 1.0  ;;  %v438_v8 = vmax.f32 %v430_v3, 1.0 }
  0xa9   :  { %554 = vrcp.f32 %v437_v5 }
  0xaa   :  { %556 = vrcp.f32 %v438_v8 }
  0xac   :  { %v551_v17 = vpop.eup %550 }
  0xad   :  { %v553_v18 = vpop.eup %552 }
  0xb3   :  { %v555_v29 = vpop.eup %554 }
  0xb4   :  { %v557_v30 = vpop.eup %556 }
  0xd9   :  { %v78_v54 = vpop.f32.mrb[0].mxu0  ;;  %v124_v55 = vpop.f32.mrb[0].mxu1 }
  0xda   :  { %v447_v57 = vmul.f32 %v543_v50, %v78_v54  ;;  %v448_v58 = vmul.f32 %v545_v52, %v124_v55  ;;  %v496_v59 = vpop.f32.mrb[1].mxu0  ;;  %v502_v60 = vpop.f32.mrb[1].mxu1 }
  0xdb   :  { %v81_v61 = vpop.f32.mrb[2].mxu0  ;;  %v127_v62 = vpop.f32.mrb[2].mxu1 }
  0xdc   :  { %456 = vst.msk [vmem:[%s705_s2] sm:$0x7] %vm455_vm4, %v447_v57  ;;  %457 = vst.msk [vmem:[%s705_s2 + $0x4] sm:$0x7] %vm455_vm4, %v448_v58  ;;  %v497_v63 = vpop.f32.mrb[3].mxu0  ;;  %v503_v0 = vpop.f32.mrb[3].mxu1 }
  0xe1   :  { %v170_v6 = vpop.f32.mrb[4].mxu0  ;;  %v216_v7 = vpop.f32.mrb[4].mxu1 }
  0xe2   :  { %v449_v9 = vmul.f32 %v547_v2, %v170_v6  ;;  %v450_v10 = vmul.f32 %v549_v4, %v216_v7  ;;  %v508_v11 = vpop.f32.mrb[5].mxu0  ;;  %v514_v12 = vpop.f32.mrb[5].mxu1 }
  0xe3   :  { %v173_v13 = vpop.f32.mrb[6].mxu0  ;;  %v219_v14 = vpop.f32.mrb[6].mxu1 }
  0xe4   :  { %458 = vst.msk [vmem:[%s705_s2 + $0x8] sm:$0x7] %vm455_vm4, %v449_v9  ;;  %459 = vst.msk [vmem:[%s705_s2 + $0xc] sm:$0x7] %vm455_vm4, %v450_v10  ;;  %v509_v15 = vpop.f32.mrb[7].mxu0  ;;  %v515_v16 = vpop.f32.mrb[7].mxu1 }
  0xe9   :  { %v262_v19 = vpop.f32.mrb[8].mxu0  ;;  %v308_v20 = vpop.f32.mrb[8].mxu1 }
  0xea   :  { %v451_v21 = vmul.f32 %v551_v17, %v262_v19  ;;  %v452_v22 = vmul.f32 %v553_v18, %v308_v20  ;;  %v520_v23 = vpop.f32.mrb[9].mxu0  ;;  %v526_v24 = vpop.f32.mrb[9].mxu1 }
  0xeb   :  { %v265_v25 = vpop.f32.mrb[10].mxu0  ;;  %v311_v26 = vpop.f32.mrb[10].mxu1 }
  0xec   :  { %460 = vst.msk [vmem:[%s705_s2 + $0x10] sm:$0x7] %vm455_vm4, %v451_v21  ;;  %461 = vst.msk [vmem:[%s705_s2 + $0x14] sm:$0x7] %vm455_vm4, %v452_v22  ;;  %v521_v27 = vpop.f32.mrb[11].mxu0  ;;  %v527_v28 = vpop.f32.mrb[11].mxu1 }
  0xf1   :  { %v354_v31 = vpop.f32.mrb[12].mxu0  ;;  %v400_v32 = vpop.f32.mrb[12].mxu1 }
  0xf2   :  { %v453_v33 = vmul.f32 %v555_v29, %v354_v31  ;;  %v454_v34 = vmul.f32 %v557_v30, %v400_v32  ;;  %v532_v35 = vpop.f32.mrb[13].mxu0  ;;  %v538_v36 = vpop.f32.mrb[13].mxu1 }
  0xf3   :  { %v357_v37 = vpop.f32.mrb[14].mxu0  ;;  %v403_v38 = vpop.f32.mrb[14].mxu1 }
  0xf4   :  { %462 = vst.msk [vmem:[%s705_s2 + $0x18] sm:$0x7] %vm455_vm4, %v453_v33  ;;  %463 = vst.msk [vmem:[%s705_s2 + $0x1c] sm:$0x7] %vm455_vm4, %v454_v34  ;;  %v533_v39 = vpop.f32.mrb[15].mxu0  ;;  %v539_v40 = vpop.f32.mrb[15].mxu1 }

// kernel: re_model_forward.7
= control target key start
LH: loop header
LB: loop body
LE: loop exit
PB: predicated region body
PF: predicated region fallthrough
CT: control target
= control target key end

     0   :  { %v438_v0 = vmov 0.0   ;;  %vm439_vm0 = vmmov 0   ;;  %vm64_vm1 = vcmask 261120   ;;  %vm301_vm2 = vcmask 130048   ;;  %s557_s4 = inlined_call_operand.vmem [shape: bf16[32,16], index: 4, kind: input, shape index: {}]   ;;  %s558_s2 = inlined_call_operand.vmem [shape: f32[2,32], index: 2, kind: input, shape index: {}]   ;;  %s559_s7 = inlined_call_operand.vmem [shape: bf16[32,128], index: 7, kind: input, shape index: {}]   ;;  %s560_s1 = inlined_call_operand.vmem [shape: f32[2,32], index: 1, kind: input, shape index: {}]   ;;  %s561_s6 = inlined_call_operand.vmem [shape: bf16[32,128], index: 6, kind: input, shape index: {}]   ;;  %s562_s8 = inlined_call_operand.vmem [shape: bf16[32,128], index: 8, kind: input, shape index: {}]   ;;  %s563_s0 = inlined_call_operand.vmem [shape: f32[2,32], index: 0, kind: input, shape index: {}]   ;;  %s564_s9 = inlined_call_operand.vmem [shape: bf16[16,128], index: 9, kind: input, shape index: {}]   ;;  %s565_s3 = inlined_call_operand.vmem [shape: bf16[2,32], index: 3, kind: input, shape index: {}]   ;;  %s566_s5 = inlined_call_operand.vmem [shape: f32[1,16], index: 5, kind: input, shape index: {}]   ;;  %s567_s10 = inlined_call_operand.vmem [shape: f32[1,128], index: 10, kind: input, shape index: {}]   ;;  %s568_s11 = inlined_call_operand.vmem [shape: f32[2,128], index: 11, kind: output, shape index: {}]  }
   0x1   :  { %389 = vmatprep.subr.bf16.mxu0 %v438_v0  ;;  %v429_v1 = vld [vmem:[%s557_s4] sm:$0xff]   ;;  %393 = vmatprep.mubr.msk.bf16.mxu0 %vm439_vm0, %v438_v0  ;;  %v430_v2 = vld [vmem:[%s557_s4 + $0x8] sm:$0xff]  }
   0x2   :  { %397 = vmatprep.subr.bf16.mxu1 %v438_v0  ;;  %401 = vmatprep.mubr.msk.bf16.mxu1 %vm439_vm0, %v438_v0  ;;  %v39_v3 = vld [vmem:[%s558_s2] sm:$0x3]  ;;  %v432_v6 = vld [vmem:[%s559_s7 + $0x8] sm:$0xff]  }
   0x3   :  { %390 = vmatpush3.bf16.msra.mxu0 %v429_v1  ;;  %v431_v4 = vld [vmem:[%s559_s7] sm:$0xff]   ;;  %v40_v5 = vpack.c.bf16 %v39_v3, %v39_v3  ;;  %v435_v11 = vld [vmem:[%s561_s6 + $0x8] sm:$0xff]  }
   0x4   :  { %391 = vmatprep.subr.bf16.mxu0 %v438_v0  ;;  %398 = vmatpush3.bf16.msra.mxu1 %v431_v4  ;;  %v115_v7 = vld [vmem:[%s560_s1] sm:$0x3]  ;;  %v436_v14 = vld [vmem:[%s562_s8 + $0x8] sm:$0xff]  }
   0x5   :  { %399 = vmatprep.subr.bf16.mxu1 %v438_v0  ;;  %v433_v8 = vld [vmem:[%s561_s6] sm:$0xff]   ;;  %v116_v9 = vpack.c.bf16 %v115_v7, %v115_v7 }
   0x6   :  { %v434_v10 = vld [vmem:[%s562_s8] sm:$0xff]  }
   0x7   :  { %392 = vmatpush3.bf16.msra.mxu0 %v430_v2  ;;  %v109_v12 = vld [vmem:[%s563_s0] sm:$0x3] }
   0x8   :  { %405 = vmatprep.subr.bf16.mxu0 %v438_v0  ;;  %400 = vmatpush3.bf16.msra.mxu1 %v432_v6  ;;  %v110_v13 = vpack.c.bf16 %v109_v12, %v109_v12  ;;  %v437_v15 = vld [vmem:[%s564_s9] sm:$0xff]  }
   0x9   :  { %413 = vmatprep.subr.bf16.mxu1 %v438_v0  ;;  %v231_v16 = vld [vmem:[%s565_s3] sm:$0x1] }
   0xa   :  { %394 = vmatmul.mubr.msk.bf16.vlgmr.msra.gmra.mrb[0].mxu0 %vm64_vm1, %v40_v5  ;;  %v359_v17 = vld [vmem:[%s566_s5] ss:$0 sm:$0xff] }
   0xb   :  { %406 = vmatpush3.bf16.msra.mxu0 %v433_v8  ;;  %409 = vmatprep.mubr.msk.bf16.mxu0 %vm439_vm0, %v438_v0  ;;  %v374_v40 = vld [vmem:[%s567_s10] ss:$0 sm:$0xff] }
   0xc   :  { %407 = vmatprep.subr.bf16.mxu0 %v438_v0  ;;  %402 = vmatmul.mubr.msk.bf16.vlgmr.msra.gmra.mrb[0].mxu1 %vm64_vm1, %v116_v9 }
   0xd   :  { %414 = vmatpush3.bf16.msra.mxu1 %v434_v10  ;;  %417 = vmatprep.mubr.msk.bf16.mxu1 %vm439_vm0, %v438_v0 }
   0xe   :  { %415 = vmatprep.subr.bf16.mxu1 %v438_v0 }
   0xf   :  { %408 = vmatpush3.bf16.msra.mxu0 %v435_v11 }
  0x10   :  { %421 = vmatprep.subr.bf16.mxu0 %v438_v0 }
  0x11   :  { %416 = vmatpush3.bf16.msra.mxu1 %v436_v14 }
  0x12   :  { %410 = vmatmul.mubr.msk.bf16.vlgmr.msra.gmra.mrb[4].mxu0 %vm64_vm1, %v110_v13 }
  0x13   :  { %422 = vmatpush3.bf16.msra.mxu0 %v437_v15  ;;  %423 = vmatprep.mubr.msk.bf16.mxu0 %vm439_vm0, %v438_v0 }
  0x14   :  { %418 = vmatmul.mubr.msk.bf16.vlgmr.msra.gmra.mrb[4].mxu1 %vm64_vm1, %v231_v16 }
  0xdd   :  { %v102_v18 = vpop.f32.mrb[0].mxu0 }
  0xde   :  { %v103_v19 = vadd.f32 %v359_v17, %v102_v18  ;;  %v395_v20 = vpop.f32.mrb[1].mxu0 }
  0xdf   :  { %v105_v21 = vpop.f32.mrb[2].mxu0  ;;  %v170_v24 = vpop.f32.mrb[0].mxu1 }
  0xe0   :  { %v108_v22 = vmax.f32 %v103_v19, 0.0  ;;  %v396_v23 = vpop.f32.mrb[3].mxu0  ;;  %v403_v25 = vpop.f32.mrb[1].mxu1 }
  0xe1   :  { %v173_v27 = vpop.f32.mrb[2].mxu1 }
  0xe2   :  { %v292_v26 = vpack.c.bf16 %v108_v22, %v108_v22  ;;  %v404_v28 = vpop.f32.mrb[3].mxu1 }
  0xe4   :  { %424 = vmatmul.mubr.msk.bf16.vlgmr.msra.gmra.mrb[8].mxu0 %vm301_vm2, %v292_v26 }
  0xe5   :  { %v225_v29 = vpop.f32.mrb[4].mxu0 }
  0xe6   :  { %v226_v30 = vadd.f32 %v225_v29, %v170_v24  ;;  %v411_v31 = vpop.f32.mrb[5].mxu0 }
  0xe7   :  { %v228_v32 = vpop.f32.mrb[6].mxu0  ;;  %v285_v34 = vpop.f32.mrb[4].mxu1 }
  0xe8   :  { %v412_v33 = vpop.f32.mrb[7].mxu0  ;;  %v291_v35 = vadd.f32 %v285_v34, %v226_v30  ;;  %v419_v36 = vpop.f32.mrb[5].mxu1 }
  0xe9   :  { %v288_v37 = vpop.f32.mrb[6].mxu1 }
  0xea   :  { %v420_v38 = vpop.f32.mrb[7].mxu1 }
 0x1b7   :  { %v339_v39 = vpop.f32.mrb[8].mxu0 }
 0x1b8   :  { %v345_v41 = vadd.f32 %v339_v39, %v291_v35  ;;  %v425_v42 = vpop.f32.mrb[9].mxu0 }
 0x1b9   :  { %v342_v43 = vpop.f32.mrb[10].mxu0 }
 0x1ba   :  { %v353_v44 = vadd.f32 %v374_v40, %v345_v41  ;;  %v426_v45 = vpop.f32.mrb[11].mxu0 }
 0x1bc   :  { %354 = vst [vmem:[%s568_s11] sm:$0x3] %v353_v44 }

</bundles_post_ra>
